<compile_context>
chip_gen: v6e
topology: v6e:2x2x1
jax: 0.10.0
libtpu: 0.0.40
codegen_flags: <defaults>
</compile_context>

<pallas_src>
import functools

import jax
import jax.numpy as jnp
from jax.experimental import pallas as pl
from jax.experimental.pallas import tpu as pltpu


def _round_up(x, m):
    return (x + m - 1) // m * m


def classifier_kernel(x_ref, w1_ref, b1_ref, w2_ref, b2_ref, w3_ref, out_ref):
    # x_ref : (tm, H)  bf16     w1_ref: (H, 64) bf16 (resident)
    # b1/b2 : (1, 64)  f32      w2_ref: (64, 64) f32 (resident)
    # w3_ref: (64, 1)  f32      out_ref: (tm, 1) f32  (raw scores, no bias3/mask)
    # Layer 1: the bandwidth-dominant matmul — bf16 operands, f32 MXU accumulate.
    h = jnp.dot(x_ref[...], w1_ref[...], preferred_element_type=jnp.float32)
    h = jnp.maximum(h + b1_ref[...], 0.0)
    # Layers 2/3 are tiny (64x64, 64x1) — keep them fully f32.
    h = jnp.maximum(
        jnp.dot(h, w2_ref[...], preferred_element_type=jnp.float32) + b2_ref[...],
        0.0)
    out_ref[...] = jnp.dot(h, w3_ref[...], preferred_element_type=jnp.float32)


@functools.partial(jax.jit, static_argnames=("tm",))
def classifier_forward(x, mask_cls, params, *, tm=1024):
    """x: (B, S, H) float32; mask_cls: (B, S) any numeric/bool dtype.

    Weights are stored (in, out) — transposed w.r.t. nn.Linear — so y = x @ W + b.
    """
    B, S, H = x.shape
    M = B * S
    w1, b1, w2, b2, w3, b3 = params

    # Row tile: multiple of 128, clamped so tiny inputs don't over-pad.
    tm = min(tm, _round_up(M, 128))
    tm = _round_up(tm, 128)
    Mp = _round_up(M, tm)

    x2d = x.reshape(M, H)
    if Mp != M:
        x2d = jnp.pad(x2d, ((0, Mp - M), (0, 0)))

    # bf16 on the dominant HBM stream (x) + its weight; accumulation stays f32.
    x2d = x2d.astype(jnp.bfloat16)
    w1b = w1.astype(jnp.bfloat16)

    grid = (Mp // tm,)
    scores = pl.pallas_call(
        classifier_kernel,
        out_shape=jax.ShapeDtypeStruct((Mp, 1), jnp.float32),
        grid_spec=pltpu.PrefetchScalarGridSpec(
            num_scalar_prefetch=0,
            grid=grid,
            in_specs=[
                pl.BlockSpec((tm, H), lambda i: (i, 0)),    # x rows (streamed)
                pl.BlockSpec((H, 64), lambda i: (0, 0)),    # w1 (resident)
                pl.BlockSpec((1, 64), lambda i: (0, 0)),    # b1 (resident)
                pl.BlockSpec((64, 64), lambda i: (0, 0)),   # w2 (resident)
                pl.BlockSpec((1, 64), lambda i: (0, 0)),    # b2 (resident)
                pl.BlockSpec((64, 1), lambda i: (0, 0)),    # w3 (resident)
            ],
            out_specs=pl.BlockSpec((tm, 1), lambda i: (i, 0)),
        ),
        compiler_params=pltpu.CompilerParams(
            dimension_semantics=("parallel",)),
    )(x2d, w1b, b1, w2, b2, w3)

    scores = scores[:M, 0].reshape(B, S)
    # Fold linear3 bias + mask here (XLA fuses this trivial epilogue); keeps
    # single-lane bias/mask DMA streams out of the kernel.
    return (scores + b3[0, 0]) * mask_cls.astype(jnp.float32)


def init_params(hidden_size, key):
    """Deterministic init mimicking nn.Linear's U(-1/sqrt(fan_in), +1/sqrt(fan_in))."""
    ks = jax.random.split(key, 6)

    def lin(kw, kb, fan_in, fan_out):
        bound = 1.0 / jnp.sqrt(fan_in)
        w = jax.random.uniform(kw, (fan_in, fan_out), jnp.float32, -bound, bound)
        b = jax.random.uniform(kb, (1, fan_out), jnp.float32, -bound, bound)
        return w, b

    w1, b1 = lin(ks[0], ks[1], hidden_size, 64)
    w2, b2 = lin(ks[2], ks[3], 64, 64)
    w3, b3 = lin(ks[4], ks[5], 64, 1)
    return (w1, b1, w2, b2, w3, b3)


def reference_forward(x, mask_cls, params):
    """Pure-JAX reference using the same mixed precision as the kernel."""
    w1, b1, w2, b2, w3, b3 = params
    h = jnp.dot(x.astype(jnp.bfloat16), w1.astype(jnp.bfloat16),
                preferred_element_type=jnp.float32) + b1[0]
    h = jax.nn.relu(h)
    h = jax.nn.relu(jnp.dot(h, w2, preferred_element_type=jnp.float32) + b2[0])
    s = (jnp.dot(h, w3, preferred_element_type=jnp.float32) + b3[0])[..., 0]
    return s * mask_cls.astype(jnp.float32)


if __name__ == "__main__":
    B, S, H = 2, 8, 768   # module default hidden_size=768, small batch/seq
    key = jax.random.PRNGKey(0)
    kx, km, kp = jax.random.split(key, 3)

    x = jax.random.normal(kx, (B, S, H), dtype=jnp.float32)
    mask_cls = (jax.random.uniform(km, (B, S)) > 0.3).astype(jnp.float32)
    params = init_params(H, kp)

    out = jax.block_until_ready(classifier_forward(x, mask_cls, params))
    ref = reference_forward(x, mask_cls, params)

    assert out.shape == (B, S)
    assert jnp.allclose(out, ref, atol=1e-3, rtol=1e-3), "mismatch vs reference"

    print("KERNEL_OK")
</pallas_src>

<mosaic_0001>
module attributes {stable_mosaic.version = 11 : i64} {
  func.func @classifier_kernel(%arg0: i32, %arg1: memref<128x768xbf16, #tpu.memory_space<vmem>>, %arg2: memref<768x64xbf16, #tpu.memory_space<vmem>>, %arg3: memref<1x64xf32, #tpu.memory_space<vmem>>, %arg4: memref<64x64xf32, #tpu.memory_space<vmem>>, %arg5: memref<1x64xf32, #tpu.memory_space<vmem>>, %arg6: memref<64x1xf32, #tpu.memory_space<vmem>>, %arg7: memref<128x1xf32, #tpu.memory_space<vmem>>) attributes {dimension_semantics = [#tpu.dimension_semantics<parallel>], iteration_bounds = array<i64: 1>, scalar_prefetch = 0 : i64, scratch_operands = 0 : i64, tpu.core_type = #tpu.core_type<tc>, window_params = [{transform_indices = @transform_0, window_bounds = array<i64: 128, 768>}, {pipeline_mode = #tpu.pipeline_mode<synchronous>, transform_indices = @transform_1, window_bounds = array<i64: 768, 64>}, {pipeline_mode = #tpu.pipeline_mode<synchronous>, transform_indices = @transform_2, window_bounds = array<i64: 1, 64>}, {pipeline_mode = #tpu.pipeline_mode<synchronous>, transform_indices = @transform_3, window_bounds = array<i64: 64, 64>}, {pipeline_mode = #tpu.pipeline_mode<synchronous>, transform_indices = @transform_4, window_bounds = array<i64: 1, 64>}, {pipeline_mode = #tpu.pipeline_mode<synchronous>, transform_indices = @transform_5, window_bounds = array<i64: 64, 1>}, {transform_indices = @transform_6, window_bounds = array<i64: 128, 1>}]} {
    %c0 = arith.constant 0 : index
    %c0_0 = arith.constant 0 : index
    %0 = vector.load %arg1[%c0, %c0_0] : memref<128x768xbf16, #tpu.memory_space<vmem>>, vector<128x768xbf16>
    %c0_1 = arith.constant 0 : index
    %c0_2 = arith.constant 0 : index
    %1 = vector.load %arg2[%c0_1, %c0_2] : memref<768x64xbf16, #tpu.memory_space<vmem>>, vector<768x64xbf16>
    %cst = arith.constant dense<0.000000e+00> : vector<128x64xf32>
    %2 = tpu.matmul %0, %1, %cst {dimension_numbers = #tpu.dot_dimension_numbers<[1], [0], [0], [1], [0, 0, 1, 1], [], []>} : vector<128x768xbf16>, vector<768x64xbf16>, vector<128x64xf32> -> vector<128x64xf32>
    %c0_3 = arith.constant 0 : index
    %c0_4 = arith.constant 0 : index
    %3 = vector.load %arg3[%c0_3, %c0_4] : memref<1x64xf32, #tpu.memory_space<vmem>>, vector<1x64xf32>
    %4 = vector.broadcast %3 : vector<1x64xf32> to vector<128x64xf32>
    %5 = arith.addf %2, %4 : vector<128x64xf32>
    %cst_5 = arith.constant 0.000000e+00 : f32
    %6 = vector.broadcast %cst_5 : f32 to vector<128x64xf32>
    %7 = arith.maximumf %5, %6 : vector<128x64xf32>
    %c0_6 = arith.constant 0 : index
    %c0_7 = arith.constant 0 : index
    %8 = vector.load %arg4[%c0_6, %c0_7] : memref<64x64xf32, #tpu.memory_space<vmem>>, vector<64x64xf32>
    %cst_8 = arith.constant dense<0.000000e+00> : vector<128x64xf32>
    %9 = tpu.matmul %7, %8, %cst_8 {dimension_numbers = #tpu.dot_dimension_numbers<[1], [0], [0], [1], [0, 0, 1, 1], [], []>} : vector<128x64xf32>, vector<64x64xf32>, vector<128x64xf32> -> vector<128x64xf32>
    %c0_9 = arith.constant 0 : index
    %c0_10 = arith.constant 0 : index
    %10 = vector.load %arg5[%c0_9, %c0_10] : memref<1x64xf32, #tpu.memory_space<vmem>>, vector<1x64xf32>
    %11 = vector.broadcast %10 : vector<1x64xf32> to vector<128x64xf32>
    %12 = arith.addf %9, %11 : vector<128x64xf32>
    %cst_11 = arith.constant 0.000000e+00 : f32
    %13 = vector.broadcast %cst_11 : f32 to vector<128x64xf32>
    %14 = arith.maximumf %12, %13 : vector<128x64xf32>
    %c0_12 = arith.constant 0 : index
    %c0_13 = arith.constant 0 : index
    %15 = vector.load %arg6[%c0_12, %c0_13] : memref<64x1xf32, #tpu.memory_space<vmem>>, vector<64x1xf32>
    %cst_14 = arith.constant dense<0.000000e+00> : vector<128x1xf32>
    %16 = tpu.matmul %14, %15, %cst_14 {dimension_numbers = #tpu.dot_dimension_numbers<[1], [0], [0], [1], [0, 0, 1, 1], [], []>} : vector<128x64xf32>, vector<64x1xf32>, vector<128x1xf32> -> vector<128x1xf32>
    %c0_15 = arith.constant 0 : index
    %c0_16 = arith.constant 0 : index
    %17 = vector.load %arg7[%c0_15, %c0_16] : memref<128x1xf32, #tpu.memory_space<vmem>>, vector<128x1xf32>
    tpu.vector_store %arg7[%c0_15, %c0_16], %16 {strides = array<i32>} : memref<128x1xf32, #tpu.memory_space<vmem>>, vector<128x1xf32>,
    return
  }
  func.func @transform_0(%arg0: i32) -> (i32, i32) {
    %c0_i32 = arith.constant 0 : i32
    %c0_i32_0 = arith.constant 0 : i32
    return %arg0, %c0_i32 : i32, i32
  }
  func.func @transform_1(%arg0: i32) -> (i32, i32) {
    %c0_i32 = arith.constant 0 : i32
    %c0_i32_0 = arith.constant 0 : i32
    %c0_i32_1 = arith.constant 0 : i32
    return %c0_i32, %c0_i32_0 : i32, i32
  }
  func.func @transform_2(%arg0: i32) -> (i32, i32) {
    %c0_i32 = arith.constant 0 : i32
    %c0_i32_0 = arith.constant 0 : i32
    %c0_i32_1 = arith.constant 0 : i32
    return %c0_i32, %c0_i32_0 : i32, i32
  }
  func.func @transform_3(%arg0: i32) -> (i32, i32) {
    %c0_i32 = arith.constant 0 : i32
    %c0_i32_0 = arith.constant 0 : i32
    %c0_i32_1 = arith.constant 0 : i32
    return %c0_i32, %c0_i32_0 : i32, i32
  }
  func.func @transform_4(%arg0: i32) -> (i32, i32) {
    %c0_i32 = arith.constant 0 : i32
    %c0_i32_0 = arith.constant 0 : i32
    %c0_i32_1 = arith.constant 0 : i32
    return %c0_i32, %c0_i32_0 : i32, i32
  }
  func.func @transform_5(%arg0: i32) -> (i32, i32) {
    %c0_i32 = arith.constant 0 : i32
    %c0_i32_0 = arith.constant 0 : i32
    %c0_i32_1 = arith.constant 0 : i32
    return %c0_i32, %c0_i32_0 : i32, i32
  }
  func.func @transform_6(%arg0: i32) -> (i32, i32) {
    %c0_i32 = arith.constant 0 : i32
    %c0_i32_0 = arith.constant 0 : i32
    return %arg0, %c0_i32 : i32, i32
  }
}

</mosaic_0001>

<bundles_post_ra>
// kernel: mul.1
= control target key start
LH: loop header
LB: loop body
LE: loop exit
PB: predicated region body
PF: predicated region fallthrough
CT: control target
= control target key end

     0   :  { %3 = vsyncpa [#allocation1], 0  ;;  %s69_s0 = inlined_call_operand.vmem [shape: f32[2,8], index: 0, kind: input, shape index: {}]   ;;  %s70_s1 = inlined_call_operand.vmem [shape: f32[2,8], index: 1, kind: input, shape index: {}]   ;;  %s71_s2 = inlined_call_operand.hbm [shape: f32[2,8], index: 2, kind: output, shape index: {}]  }
   0x1   :  { %v4_v0 = vld [vmem:[%s69_s0] sm:$0x3] }
   0x2   :  { %v5_v1 = vld [vmem:[%s70_s1] sm:$0x3]  ;;  %s44_s1 = smov [#allocation0]  }
   0x3   :  { %v8_v2 = vmul.f32 %v5_v1, %v4_v0  ;;  %s15_s12 = sshll.u32 %s44_s1, 4  ;;  %s16_s12 = int_to_ptr.vmem [resolvable:$true] %s15_s12 }
   0x4   :  { %s22_s13 = scalar_lea.vmem %s16_s12, 32  ;;  %p27_p1 = scmp.lt.s32.totalorder %s16_s12, %s16_s12 }
   0x5   :  { %10 = vst [vmem:[#allocation0] sm:$0x3] %v8_v2  ;;  %p23_p0 = scmp.ne.s32.totalorder %s16_s12, %s22_s13  ;;  %p28_p2 = scmp.lt.s32.totalorder %s22_s13, %s22_s13 }
   0x7   :  { %p29_p3 = por %p28_p2, %p27_p1 }
   0x9   :  { %p30_p4 = pnand %p29_p3, %p23_p0 }
   0xb   :  { %33 = shalt.err (!%p30_p4)
}
   0xc   :  { %18 = dma.vmem_to_hbm [thread:$0]  %s16_s12, 32, %s71_s2, [#allocation1]  }
   0xd   :  { %42 = dma.done.wait [#allocation1], 32  }
   0xe   :  { %43 = vsyncadd [#allocation1], 4294967264 }
   0xf   :  { %20 = vsyncpa [#allocation1], 1 }

// kernel: classifier_forward.1
= control target key start
LH: loop header
LB: loop body
LE: loop exit
PB: predicated region body
PF: predicated region fallthrough
CT: control target
= control target key end

     0   :  { %vm1025_vm0 = vcmask 523264   ;;  %vm1436_vm1 = vcmask 7168   ;;  %s2645_s1 = inlined_call_operand.vmem [shape: bf16[768,64], index: 1, kind: input, shape index: {}]   ;;  %s2646_s0 = inlined_call_operand.vmem [shape: bf16[128,768], index: 0, kind: input, shape index: {}]   ;;  %s2647_s3 = inlined_call_operand.vmem [shape: f32[64,64], index: 3, kind: input, shape index: {}]   ;;  %s2648_s5 = inlined_call_operand.vmem [shape: f32[64,1], index: 5, kind: input, shape index: {}]   ;;  %s2649_s2 = inlined_call_operand.vmem [shape: f32[1,64], index: 2, kind: input, shape index: {}]   ;;  %s2650_s4 = inlined_call_operand.vmem [shape: f32[1,64], index: 4, kind: input, shape index: {}]   ;;  %s2651_s6 = inlined_call_operand.vmem [shape: f32[128,1], index: 6, kind: output, shape index: {}]  }
   0x1   :  { %v1907_v0 = vld [vmem:[%s2645_s1 + $0x78] sm:$0xff]   ;;  %v1911_v4 = vld [vmem:[%s2645_s1 + $0x70] sm:$0xff]   ;;  %v1915_v8 = vld [vmem:[%s2645_s1 + $0x68] sm:$0xff]  }
   0x2   :  { %v1908_v1 = vld [vmem:[%s2645_s1 + $0x38] sm:$0xff]   ;;  %1587 = vmatprep.subr.bf16.mxu0 %v1907_v0  ;;  %v1912_v5 = vld [vmem:[%s2645_s1 + $0x30] sm:$0xff]   ;;  %v1916_v9 = vld [vmem:[%s2645_s1 + $0x28] sm:$0xff]  }
   0x3   :  { %v1909_v2 = vld [vmem:[%s2645_s1 + $0xf8] sm:$0xff]   ;;  %1588 = vmatpush3.bf16.msra.mxu0 %v1908_v1  ;;  %v1913_v6 = vld [vmem:[%s2645_s1 + $0xf0] sm:$0xff]   ;;  %v1917_v10 = vld [vmem:[%s2645_s1 + $0xe8] sm:$0xff]  }
   0x4   :  { %v1910_v3 = vld [vmem:[%s2645_s1 + $0xb8] sm:$0xff]   ;;  %1651 = vmatprep.subr.bf16.mxu1 %v1909_v2  ;;  %1589 = vmatprep.subr.bf16.mxu0 %v1911_v4  ;;  %v1914_v7 = vld [vmem:[%s2645_s1 + $0xb0] sm:$0xff]   ;;  %v1918_v11 = vld [vmem:[%s2645_s1 + $0xa8] sm:$0xff]  }
   0x5   :  { %1652 = vmatpush3.bf16.msra.mxu1 %v1910_v3  ;;  %v1919_v12 = vld [vmem:[%s2645_s1 + $0x60] sm:$0xff]   ;;  %v1923_v16 = vld [vmem:[%s2645_s1 + $0x58] sm:$0xff]   ;;  %v1927_v20 = vld [vmem:[%s2645_s1 + $0x50] sm:$0xff]  }
   0x6   :  { %1653 = vmatprep.subr.bf16.mxu1 %v1913_v6  ;;  %v1920_v13 = vld [vmem:[%s2645_s1 + $0x20] sm:$0xff]   ;;  %v1924_v17 = vld [vmem:[%s2645_s1 + $0x18] sm:$0xff]   ;;  %v1928_v21 = vld [vmem:[%s2645_s1 + $0x10] sm:$0xff]  }
   0x7   :  { %1590 = vmatpush3.bf16.msra.mxu0 %v1912_v5  ;;  %v1921_v14 = vld [vmem:[%s2645_s1 + $0xe0] sm:$0xff]   ;;  %v1925_v18 = vld [vmem:[%s2645_s1 + $0xd8] sm:$0xff]   ;;  %v1929_v22 = vld [vmem:[%s2645_s1 + $0xd0] sm:$0xff]  }
   0x8   :  { %1591 = vmatprep.subr.bf16.mxu0 %v1915_v8  ;;  %v1922_v15 = vld [vmem:[%s2645_s1 + $0xa0] sm:$0xff]   ;;  %v1926_v19 = vld [vmem:[%s2645_s1 + $0x98] sm:$0xff]   ;;  %v1930_v23 = vld [vmem:[%s2645_s1 + $0x90] sm:$0xff]  }
   0x9   :  { %1654 = vmatpush3.bf16.msra.mxu1 %v1914_v7  ;;  %v1931_v24 = vld [vmem:[%s2645_s1 + $0x48] sm:$0xff]   ;;  %v1935_v28 = vld [vmem:[%s2645_s1 + $0x40] sm:$0xff]   ;;  %v1942_v34 = vld [vmem:[%s2645_s1 + $0x178] sm:$0xff]  }
   0xa   :  { %1655 = vmatprep.subr.bf16.mxu1 %v1917_v10  ;;  %v1932_v25 = vld [vmem:[%s2645_s1 + $0x8] sm:$0xff]   ;;  %v1936_v29 = vld [vmem:[%s2645_s1] sm:$0xff]   ;;  %v1946_v37 = vld [vmem:[%s2645_s1 + $0x138] sm:$0xff]  }
   0xb   :  { %1592 = vmatpush3.bf16.msra.mxu0 %v1916_v9  ;;  %v1933_v26 = vld [vmem:[%s2645_s1 + $0xc8] sm:$0xff]   ;;  %v1937_v30 = vld [vmem:[%s2645_s1 + $0xc0] sm:$0xff]   ;;  %v1950_v40 = vld [vmem:[%s2645_s1 + $0x170] sm:$0xff]  }
   0xc   :  { %1593 = vmatprep.subr.bf16.mxu0 %v1919_v12  ;;  %v1934_v27 = vld [vmem:[%s2645_s1 + $0x88] sm:$0xff]   ;;  %v1938_v31 = vld [vmem:[%s2646_s0] ss:$24 sps:$4 sm:$0xff]   ;;  %v1940_v32 = vld [vmem:[%s2646_s0 + $0x4] ss:$24 sps:$4 sm:$0xff]  }
   0xd   :  { %1656 = vmatpush3.bf16.msra.mxu1 %v1918_v11  ;;  %v1941_v33 = vld [vmem:[%s2645_s1 + $0x80] sm:$0xff]   ;;  %735 = vmatprep.mubr.bf16.mxu0 %v1940_v32  ;;  %v1947_v38 = vld [vmem:[%s2646_s0 + $0x34] ss:$24 sps:$4 sm:$0xff]   ;;  %v1949_v39 = vld [vmem:[%s2646_s0 + $0x30] ss:$24 sps:$4 sm:$0xff]  }
   0xe   :  { %1657 = vmatprep.subr.bf16.mxu1 %v1921_v14  ;;  %v1943_v35 = vld [vmem:[%s2646_s0 + $0x8] ss:$24 sps:$4 sm:$0xff]   ;;  %v1945_v36 = vld [vmem:[%s2646_s0 + $0xc] ss:$24 sps:$4 sm:$0xff]   ;;  %v1951_v41 = vld [vmem:[%s2646_s0 + $0x3c] ss:$24 sps:$4 sm:$0xff]  }
   0xf   :  { %1594 = vmatpush3.bf16.msra.mxu0 %v1920_v13  ;;  %832 = vmatprep.mubr.bf16.mxu1 %v1945_v36  ;;  %v1953_v42 = vld [vmem:[%s2645_s1 + $0x130] sm:$0xff]   ;;  %v1955_v44 = vld [vmem:[%s2646_s0 + $0x64] ss:$24 sps:$4 sm:$0xff]   ;;  %v1958_v45 = vld [vmem:[%s2645_s1 + $0x168] sm:$0xff]  }
  0x10   :  { %1595 = vmatprep.subr.bf16.mxu0 %v1923_v16  ;;  %v1954_v43 = vld [vmem:[%s2646_s0 + $0x38] ss:$24 sps:$4 sm:$0xff]   ;;  %v1959_v46 = vld [vmem:[%s2646_s0 + $0x6c] ss:$24 sps:$4 sm:$0xff]   ;;  %v1962_v51 = vld [vmem:[%s2646_s0 + $0x68] ss:$24 sps:$4 sm:$0xff]  }
  0x11   :  { %1658 = vmatpush3.bf16.msra.mxu1 %v1922_v15  ;;  %v1961_v47 = vld [vmem:[%s2645_s1 + $0x128] sm:$0xff]   ;;  %v1957_v48 = vld [vmem:[%s2646_s0 + $0x60] ss:$24 sps:$4 sm:$0xff]   ;;  %v1967_v53 = vld [vmem:[%s2646_s0 + $0x9c] ss:$24 sps:$4 sm:$0xff]  }
  0x12   :  { %1659 = vmatprep.subr.bf16.mxu1 %v1925_v18  ;;  %v1963_v49 = vld [vmem:[%s2646_s0 + $0x94] ss:$24 sps:$4 sm:$0xff]   ;;  %v1966_v50 = vld [vmem:[%s2645_s1 + $0x160] sm:$0xff]   ;;  %v1974_v54 = vld [vmem:[%s2645_s1 + $0x158] sm:$0xff]  }
  0x13   :  { %1596 = vmatpush3.bf16.msra.mxu0 %v1924_v17  ;;  %v1969_v52 = vld [vmem:[%s2645_s1 + $0x120] sm:$0xff]   ;;  %v1977_v55 = vld [vmem:[%s2645_s1 + $0x118] sm:$0xff]   ;;  %v1965_v56 = vld [vmem:[%s2646_s0 + $0x90] ss:$24 sps:$4 sm:$0xff]  }
  0x14   :  { %1597 = vmatprep.subr.bf16.mxu0 %v1927_v20  ;;  %v1971_v57 = vld [vmem:[%s2646_s0 + $0xc4] ss:$24 sps:$4 sm:$0xff]   ;;  %v1982_v58 = vld [vmem:[%s2645_s1 + $0x150] sm:$0xff]   ;;  %v1990_v62 = vld [vmem:[%s2645_s1 + $0x148] sm:$0xff]  }
  0x15   :  { %1660 = vmatpush3.bf16.msra.mxu1 %v1926_v19  ;;  %v1970_v59 = vld [vmem:[%s2646_s0 + $0x98] ss:$24 sps:$4 sm:$0xff]   ;;  %v1975_v60 = vld [vmem:[%s2646_s0 + $0xcc] ss:$24 sps:$4 sm:$0xff]   ;;  %v1978_v2 = vld [vmem:[%s2646_s0 + $0xc8] ss:$24 sps:$4 sm:$0xff]  }
  0x16   :  { %1661 = vmatprep.subr.bf16.mxu1 %v1929_v22  ;;  %v1985_v61 = vld [vmem:[%s2645_s1 + $0x110] sm:$0xff]   ;;  %v1973_v63 = vld [vmem:[%s2646_s0 + $0xc0] ss:$24 sps:$4 sm:$0xff]   ;;  %v1993_v1 = vld [vmem:[%s2645_s1 + $0x108] sm:$0xff]  }
  0x17   :  { %1598 = vmatpush3.bf16.msra.mxu0 %v1928_v21  ;;  %v1979_v0 = vld [vmem:[%s2646_s0 + $0xf4] ss:$24 sps:$4 sm:$0xff]   ;;  %v1998_v3 = vld [vmem:[%s2645_s1 + $0x140] sm:$0xff]   ;;  %v1981_v6 = vld [vmem:[%s2646_s0 + $0xf0] ss:$24 sps:$4 sm:$0xff]  }
  0x18   :  { %1599 = vmatprep.subr.bf16.mxu0 %v1931_v24  ;;  %v1983_v4 = vld [vmem:[%s2646_s0 + $0xfc] ss:$24 sps:$4 sm:$0xff]   ;;  %v2001_v5 = vld [vmem:[%s2645_s1 + $0x100] sm:$0xff]   ;;  %v1986_v8 = vld [vmem:[%s2646_s0 + $0xf8] ss:$24 sps:$4 sm:$0xff]  }
  0x19   :  { %1662 = vmatpush3.bf16.msra.mxu1 %v1930_v23  ;;  %v1987_v7 = vld [vmem:[%s2646_s0 + $0x124] ss:$24 sps:$4 sm:$0xff]   ;;  %v1989_v10 = vld [vmem:[%s2646_s0 + $0x120] ss:$24 sps:$4 sm:$0xff]   ;;  %v1995_v11 = vld [vmem:[%s2646_s0 + $0x154] ss:$24 sps:$4 sm:$0xff]  }
  0x1a   :  { %1663 = vmatprep.subr.bf16.mxu1 %v1933_v26  ;;  %v1991_v9 = vld [vmem:[%s2646_s0 + $0x12c] ss:$24 sps:$4 sm:$0xff]   ;;  %v1994_v12 = vld [vmem:[%s2646_s0 + $0x128] ss:$24 sps:$4 sm:$0xff]   ;;  %v1999_v13 = vld [vmem:[%s2646_s0 + $0x15c] ss:$24 sps:$4 sm:$0xff]  }
  0x1b   :  { %1600 = vmatpush3.bf16.msra.mxu0 %v1932_v25  ;;  %v1997_v14 = vld [vmem:[%s2646_s0 + $0x150] ss:$24 sps:$4 sm:$0xff]   ;;  %v2005_v15 = vld [vmem:[%s2646_s0 + $0x14] ss:$24 sps:$4 sm:$0xff]   ;;  %v2006_v18 = vld [vmem:[%s2646_s0 + $0x44] ss:$24 sps:$4 sm:$0xff]  }
  0x1c   :  { %1601 = vmatprep.subr.bf16.mxu0 %v1935_v28  ;;  %v2002_v16 = vld [vmem:[%s2646_s0 + $0x158] ss:$24 sps:$4 sm:$0xff]   ;;  %v2009_v20 = vld [vmem:[%s2646_s0 + $0x74] ss:$24 sps:$4 sm:$0xff]   ;;  %v2012_v22 = vld [vmem:[%s2646_s0 + $0xa4] ss:$24 sps:$4 sm:$0xff]  }
  0x1d   :  { %1664 = vmatpush3.bf16.msra.mxu1 %v1934_v27  ;;  %v2003_v17 = vld [vmem:[%s2646_s0 + $0x10] ss:$24 sps:$4 sm:$0xff]   ;;  %v2008_v19 = vld [vmem:[%s2646_s0 + $0x40] ss:$24 sps:$4 sm:$0xff]   ;;  %v2015_v24 = vld [vmem:[%s2646_s0 + $0xd4] ss:$24 sps:$4 sm:$0xff]  }
  0x1e   :  { %1665 = vmatprep.subr.bf16.mxu1 %v1937_v30  ;;  %v2011_v21 = vld [vmem:[%s2646_s0 + $0x70] ss:$24 sps:$4 sm:$0xff]   ;;  %v2014_v23 = vld [vmem:[%s2646_s0 + $0xa0] ss:$24 sps:$4 sm:$0xff]   ;;  %v2018_v26 = vld [vmem:[%s2646_s0 + $0x104] ss:$24 sps:$4 sm:$0xff]  }
  0x1f   :  { %1602 = vmatpush3.bf16.msra.mxu0 %v1936_v29  ;;  %v2017_v25 = vld [vmem:[%s2646_s0 + $0xd0] ss:$24 sps:$4 sm:$0xff]   ;;  %v2020_v27 = vld [vmem:[%s2646_s0 + $0x100] ss:$24 sps:$4 sm:$0xff]   ;;  %v2021_v28 = vld [vmem:[%s2646_s0 + $0x134] ss:$24 sps:$4 sm:$0xff]  }
  0x20   :  { %1715 = vmatprep.subr.bf16.mxu0 %v1942_v34  ;;  %v2023_v29 = vld [vmem:[%s2646_s0 + $0x130] ss:$24 sps:$4 sm:$0xff]   ;;  %v2024_v30 = vld [vmem:[%s2646_s0 + $0x164] ss:$24 sps:$4 sm:$0xff]   ;;  %v2026_v32 = vld [vmem:[%s2646_s0 + $0x160] ss:$24 sps:$4 sm:$0xff]  }
  0x21   :  { %1666 = vmatpush3.bf16.msra.mxu1 %v1941_v33  ;;  %v1016_v33 = vld [vmem:[%s2647_s3 + $0x30] sm:$0xff]  ;;  %v1015_v34 = vld [vmem:[%s2647_s3 + $0x28] sm:$0xff]  ;;  %v1013_v36 = vld [vmem:[%s2647_s3 + $0x18] sm:$0xff] }
  0x22   :  { %736 = vmatmul.mubr.bf16.vlgmr.msra.gmra.mxu0 %v1938_v31  ;;  %v1017_v31 = vld [vmem:[%s2647_s3 + $0x38] sm:$0xff] }
  0x23   :  { %1716 = vmatpush3.bf16.msra.mxu0 %v1946_v37  ;;  %743 = vmatprep.mubr.bf16.mxu0 %v1947_v38  ;;  %v1012_v37 = vld [vmem:[%s2647_s3 + $0x10] sm:$0xff]  ;;  %v1011_v38 = vld [vmem:[%s2647_s3 + $0x8] sm:$0xff] }
  0x24   :  { %833 = vmatmul.mubr.bf16.vlgmr.msra.gmra.mxu1 %v1943_v35  ;;  %1717 = vmatprep.subr.bf16.mxu0 %v1950_v40  ;;  %v1014_v35 = vld [vmem:[%s2647_s3 + $0x20] sm:$0xff] }
  0x25   :  { %840 = vmatprep.mubr.bf16.mxu1 %v1951_v41  ;;  %1827 = vmatprep.subr.mxu1 %v1017_v31 }
  0x26   :  { %1828 = vmatpush3.msra.mxu1 %v1017_v31 }
  0x27   :  { %1718 = vmatpush3.bf16.msra.mxu0 %v1953_v42  ;;  %1829 = vmatprep.subr.mxu1 %v1016_v33 }
  0x28   :  { %1719 = vmatprep.subr.bf16.mxu0 %v1958_v45  ;;  %1830 = vmatpush3.msra.mxu1 %v1016_v33 }
  0x29   :  { %1831 = vmatprep.subr.mxu1 %v1015_v34 }
  0x2a   :  { %744 = vmatmul.mubr.bf16.gmra.mxu0 %v1949_v39  ;;  %1832 = vmatpush3.msra.mxu1 %v1015_v34  ;;  %v1010_v39 = vld [vmem:[%s2647_s3] sm:$0xff] }
  0x2b   :  { %751 = vmatprep.mubr.bf16.mxu0 %v1955_v44  ;;  %1720 = vmatpush3.bf16.msra.mxu0 %v1961_v47 }
  0x2c   :  { %841 = vmatmul.mubr.bf16.gmra.mxu1 %v1954_v43  ;;  %1721 = vmatprep.subr.bf16.mxu0 %v1966_v50 }
  0x2d   :  { %848 = vmatprep.mubr.bf16.mxu1 %v1959_v46  ;;  %1833 = vmatprep.subr.mxu1 %v1014_v35  ;;  %v2377_v46 = vld [vmem:[%s2648_s5 + $0x38] sm:$0xff] }
  0x2e   :  { %1834 = vmatpush3.msra.mxu1 %v1014_v35 }
  0x2f   :  { %1722 = vmatpush3.bf16.msra.mxu0 %v1969_v52  ;;  %1835 = vmatprep.subr.mxu1 %v1013_v36 }
  0x30   :  { %1723 = vmatprep.subr.bf16.mxu0 %v1974_v54  ;;  %1836 = vmatpush3.msra.mxu1 %v1013_v36 }
  0x31   :  { %1837 = vmatprep.subr.mxu1 %v1012_v37 }
  0x32   :  { %752 = vmatmul.mubr.bf16.gmra.mxu0 %v1957_v48  ;;  %1838 = vmatpush3.msra.mxu1 %v1012_v37 }
  0x33   :  { %759 = vmatprep.mubr.bf16.mxu0 %v1963_v49  ;;  %1724 = vmatpush3.bf16.msra.mxu0 %v1977_v55 }
  0x34   :  { %849 = vmatmul.mubr.bf16.gmra.mxu1 %v1962_v51  ;;  %1725 = vmatprep.subr.bf16.mxu0 %v1982_v58 }
  0x35   :  { %856 = vmatprep.mubr.bf16.mxu1 %v1967_v53  ;;  %1839 = vmatprep.subr.mxu1 %v1011_v38 }
  0x36   :  { %1840 = vmatpush3.msra.mxu1 %v1011_v38 }
  0x37   :  { %1726 = vmatpush3.bf16.msra.mxu0 %v1985_v61  ;;  %1841 = vmatprep.subr.mxu1 %v1010_v39 }
  0x38   :  { %1727 = vmatprep.subr.bf16.mxu0 %v1990_v62  ;;  %1842 = vmatpush3.msra.mxu1 %v1010_v39 }
  0x39   :  { %1867 = vmatprep.subr.mxu1 %v2377_v46 }
  0x3a   :  { %760 = vmatmul.mubr.bf16.gmra.mxu0 %v1965_v56 }
  0x3b   :  { %767 = vmatprep.mubr.bf16.mxu0 %v1971_v57  ;;  %1728 = vmatpush3.bf16.msra.mxu0 %v1993_v1 }
  0x3c   :  { %857 = vmatmul.mubr.bf16.gmra.mxu1 %v1970_v59  ;;  %1729 = vmatprep.subr.bf16.mxu0 %v1998_v3 }
  0x3d   :  { %864 = vmatprep.mubr.bf16.mxu1 %v1975_v60 }
  0x3f   :  { %1730 = vmatpush3.bf16.msra.mxu0 %v2001_v5 }
  0x42   :  { %768 = vmatmul.mubr.bf16.gmra.mxu0 %v1973_v63 }
  0x43   :  { %775 = vmatprep.mubr.bf16.mxu0 %v1979_v0 }
  0x44   :  { %865 = vmatmul.mubr.bf16.gmra.mxu1 %v1978_v2 }
  0x45   :  { %872 = vmatprep.mubr.bf16.mxu1 %v1983_v4 }
  0x4a   :  { %776 = vmatmul.mubr.bf16.gmra.mxu0 %v1981_v6 }
  0x4b   :  { %783 = vmatprep.mubr.bf16.mxu0 %v1987_v7 }
  0x4c   :  { %873 = vmatmul.mubr.bf16.gmra.mxu1 %v1986_v8 }
  0x4d   :  { %880 = vmatprep.mubr.bf16.mxu1 %v1991_v9 }
  0x52   :  { %784 = vmatmul.mubr.bf16.gmra.mxu0 %v1989_v10 }
  0x53   :  { %791 = vmatprep.mubr.bf16.mxu0 %v1995_v11 }
  0x54   :  { %881 = vmatmul.mubr.bf16.gmra.mxu1 %v1994_v12 }
  0x55   :  { %888 = vmatprep.mubr.bf16.mxu1 %v1999_v13 }
  0x5a   :  { %792 = vmatmul.mubr.bf16.gmra.mxu0 %v1997_v14 }
  0x5b   :  { %929 = vmatprep.mubr.bf16.mxu0 %v2005_v15 }
  0x5c   :  { %889 = vmatmul.mubr.bf16.gmra.mxu1 %v2002_v16 }
  0x62   :  { %930 = vmatmul.mubr.bf16.vlgmr.msra.gmra.mxu0 %v2003_v17 }
  0x63   :  { %937 = vmatprep.mubr.bf16.mxu0 %v2006_v18 }
  0x6a   :  { %938 = vmatmul.mubr.bf16.gmra.mxu0 %v2008_v19 }
  0x6b   :  { %945 = vmatprep.mubr.bf16.mxu0 %v2009_v20 }
  0x72   :  { %946 = vmatmul.mubr.bf16.gmra.mxu0 %v2011_v21 }
  0x73   :  { %953 = vmatprep.mubr.bf16.mxu0 %v2012_v22 }
  0x7a   :  { %954 = vmatmul.mubr.bf16.gmra.mxu0 %v2014_v23 }
  0x7b   :  { %961 = vmatprep.mubr.bf16.mxu0 %v2015_v24  ;;  %v2447_v24 = vld [vmem:[%s2649_s2] ss:$0 sm:$0xff] }
  0x82   :  { %962 = vmatmul.mubr.bf16.gmra.mxu0 %v2017_v25 }
  0x83   :  { %969 = vmatprep.mubr.bf16.mxu0 %v2018_v26 }
  0x8a   :  { %970 = vmatmul.mubr.bf16.gmra.mxu0 %v2020_v27 }
  0x8b   :  { %977 = vmatprep.mubr.bf16.mxu0 %v2021_v28 }
  0x92   :  { %978 = vmatmul.mubr.bf16.gmra.mxu0 %v2023_v29 }
  0x93   :  { %985 = vmatprep.mubr.bf16.mxu0 %v2024_v30 }
  0x9a   :  { %986 = vmatmul.mubr.bf16.gmra.mxu0 %v2026_v32 }
  0xe2   :  { %v1603_v40 = vpop.f32.mrf.mxu0 }
  0xe4   :  { %v1604_v41 = vpop.f32.mrf.mxu0  ;;  %v1667_v42 = vpop.f32.mrf.mxu1 }
  0xe5   :  { %v1605_v23 = vadd.f32 %v1604_v41, %v1603_v40 }
  0xe6   :  { %v1606_v43 = vpop.f32.mrf.mxu0  ;;  %v1668_v44 = vpop.f32.mrf.mxu1 }
  0xe7   :  { %v738_v28 = vadd.f32 %v1605_v23, %v2447_v24  ;;  %v1669_v29 = vadd.f32 %v1668_v44, %v1667_v42 }
  0xe8   :  { %v1607_v45 = vpop.f32.mrf.mxu0  ;;  %v1670_v47 = vpop.f32.mrf.mxu1 }
  0xe9   :  { %v1608_v30 = vadd.f32 %v1607_v45, %v1606_v43  ;;  %v835_v35 = vadd.f32 %v1669_v29, %v738_v28 }
  0xea   :  { %v1609_v48 = vpop.f32.mrf.mxu0  ;;  %v1671_v49 = vpop.f32.mrf.mxu1 }
  0xeb   :  { %v741_v36 = vadd.f32 %v1608_v30, %v2447_v24  ;;  %v1672_v37 = vadd.f32 %v1671_v49, %v1670_v47 }
  0xec   :  { %v1610_v50 = vpop.f32.mrf.mxu0  ;;  %v1673_v51 = vpop.f32.mrf.mxu1 }
  0xed   :  { %v1611_v33 = vadd.f32 %v1610_v50, %v1609_v48  ;;  %v838_v42 = vadd.f32 %v1672_v37, %v741_v36 }
  0xee   :  { %v1612_v52 = vpop.f32.mrf.mxu0  ;;  %v1674_v54 = vpop.f32.mrf.mxu1 }
  0xf0   :  { %v1613_v53 = vpop.f32.mrf.mxu0  ;;  %v2384_v57 = vpop.f32.mrf.mxu1 }
  0xf1   :  { %v1614_v43 = vadd.f32 %v1613_v53, %v1612_v52 }
  0xf2   :  { %v2380_v55 = vpop.f32.mrf.mxu0  ;;  %v2390_v60 = vpop.f32.mrf.mxu1 }
  0xf3   :  { %v749_v30 = vadd.f32 %v1614_v43, %v2447_v24 }
  0xf4   :  { %v2382_v56 = vpop.f32.mrf.mxu0  ;;  %v2396_v63 = vpop.f32.mrf.mxu1 }
  0xf5   :  { %v1617_v49 = vadd.f32 %v2382_v56, %v2380_v55 }
  0xf6   :  { %v2386_v58 = vpop.f32.mrf.mxu0  ;;  %v2402_v2 = vpop.f32.mrf.mxu1 }
  0xf7   :  { %v754_v55 = vadd.f32 %v1617_v49, %v2447_v24  ;;  %v1681_v56 = vadd.f32 %v2402_v2, %v2396_v63  ;;  %v1239_v63 = vld [vmem:[%s2648_s5 + $0x20] sm:$0xff] }
  0xf8   :  { %v2388_v59 = vpop.f32.mrf.mxu0  ;;  %v2408_v5 = vpop.f32.mrf.mxu1 }
  0xf9   :  { %v851_v2 = vadd.f32 %v1681_v56, %v754_v55 }
  0xfa   :  { %v2392_v61 = vpop.f32.mrf.mxu0  ;;  %v2414_v8 = vpop.f32.mrf.mxu1 }
  0xfc   :  { %v2394_v62 = vpop.f32.mrf.mxu0  ;;  %v2420_v11 = vpop.f32.mrf.mxu1 }
  0xfe   :  { %v2398_v0 = vpop.f32.mrf.mxu0  ;;  %v2426_v14 = vpop.f32.mrf.mxu1 }
 0x100   :  { %v2400_v1 = vpop.f32.mrf.mxu0  ;;  %v2432_v17 = vpop.f32.mrf.mxu1 }
 0x102   :  { %v2404_v3 = vpop.f32.mrf.mxu0  ;;  %v2438_v20 = vpop.f32.mrf.mxu1 }
 0x104   :  { %v2406_v4 = vpop.f32.mrf.mxu0  ;;  %v2449_v25 = vpop.f32.mrf.mxu1 }
 0x106   :  { %v2410_v6 = vpop.f32.mrf.mxu0  ;;  %v2456_v31 = vpop.f32.mrf.mxu1 }
 0x107   :  { %v1693_v56 = vadd.f32 %v2456_v31, %v2449_v25 }
 0x108   :  { %v2412_v7 = vpop.f32.mrf.mxu0  ;;  %v2459_v39 = vpop.f32.mrf.mxu1 }
 0x10a   :  { %v2416_v9 = vpop.f32.mrf.mxu0  ;;  %v2462_v48 = vpop.f32.mrf.mxu1 }
 0x10b   :  { %v1696_v25 = vadd.f32 %v2462_v48, %v2459_v39 }
 0x10c   :  { %v2418_v10 = vpop.f32.mrf.mxu0  ;;  %v2470_v53 = vpop.f32.mrf.mxu1 }
 0x10e   :  { %v2422_v12 = vpop.f32.mrf.mxu0  ;;  %v2485_v37 = vpop.f32.mrf.mxu1 }
 0x110   :  { %v2424_v13 = vpop.f32.mrf.mxu0  ;;  %v2496_v43 = vpop.f32.mrf.mxu1 }
 0x112   :  { %v2428_v15 = vpop.f32.mrf.mxu0  ;;  %v1701_v49 = vpop.f32.mrf.mxu1 }
 0x114   :  { %v2430_v16 = vpop.f32.mrf.mxu0 }
 0x116   :  { %v2434_v18 = vpop.f32.mrf.mxu0 }
 0x118   :  { %v2436_v19 = vpop.f32.mrf.mxu0 }
 0x11a   :  { %v2440_v21 = vpop.f32.mrf.mxu0 }
 0x11c   :  { %v2442_v22 = vpop.f32.mrf.mxu0 }
 0x11e   :  { %v2451_v26 = vpop.f32.mrf.mxu0 }
 0x11f   :  { %2652 = vst [vmem:[#allocation2_spill] sm:$0xff] %v2451_v26  ;;  %v1675_v26 = vadd.f32 %v1674_v54, %v1673_v51  ;;  %v1678_v51 = vadd.f32 %v2390_v60, %v2384_v57  ;;  %v1240_v57 = vld [vmem:[%s2648_s5 + $0x28] sm:$0xff] }
 0x120   :  { %v2453_v27 = vpop.f32.mrf.mxu0 }
 0x121   :  { %2653 = vst [vmem:[#allocation3_spill] sm:$0xff] %v2453_v27  ;;  %v746_v27 = vadd.f32 %v1611_v33, %v2447_v24  ;;  %v1241_v33 = vld [vmem:[%s2648_s5 + $0x30] sm:$0xff]  ;;  %v846_v60 = vadd.f32 %v1678_v51, %v749_v30 }
 0x122   :  { %v1731_v32 = vpop.f32.mrf.mxu0 }
 0x123   :  { %v843_v47 = vadd.f32 %v1675_v26, %v746_v27  ;;  %v1620_v27 = vadd.f32 %v2388_v59, %v2386_v58 }
 0x124   :  { %v1732_v34 = vpop.f32.mrf.mxu0 }
 0x125   :  { %v1733_v38 = vadd.f32 %v1732_v34, %v1731_v32  ;;  %v757_v59 = vadd.f32 %v1620_v27, %v2447_v24 }
 0x126   :  { %v1734_v40 = vpop.f32.mrf.mxu0 }
 0x127   :  { %v932_v41 = vadd.f32 %v1733_v38, %v835_v35 }
 0x128   :  { %v1735_v23 = vpop.f32.mrf.mxu0 }
 0x129   :  { %v994_v44 = vmax.f32 %v932_v41, 0.0  ;;  %v1736_v45 = vadd.f32 %v1735_v23, %v1734_v40  ;;  %v1623_v40 = vadd.f32 %v2394_v62, %v2392_v61  ;;  %v1684_v41 = vadd.f32 %v2414_v8, %v2408_v5 }
 0x12a   :  { %v1737_v50 = vpop.f32.mrf.mxu0  ;;  %v1687_v61 = vadd.f32 %v2426_v14, %v2420_v11  ;;  %v1626_v5 = vadd.f32 %v2400_v1, %v2398_v0  ;;  %v1690_v11 = vadd.f32 %v2438_v20, %v2432_v17  ;;  %v1703_v0 = vpop.f32.mrf.mxu1 }
 0x12b   :  { %v935_v28 = vadd.f32 %v1736_v45, %v838_v42  ;;  %1843 = vmatprep.mubr.msk.f32.mxu1 %vm1025_vm0, %v994_v44 }
 0x12c   :  { %v1738_v29 = vpop.f32.mrf.mxu0  ;;  %v1704_v17 = vpop.f32.mrf.mxu1 }
 0x12d   :  { %v995_v54 = vmax.f32 %v935_v28, 0.0  ;;  %v1739_v52 = vadd.f32 %v1738_v29, %v1737_v50  ;;  %v762_v50 = vadd.f32 %v1623_v40, %v2447_v24  ;;  %v854_v28 = vadd.f32 %v1684_v41, %v757_v59 }
 0x12e   :  { %v1740_v32 = vpop.f32.mrf.mxu0 }
 0x12f   :  { %v940_v34 = vadd.f32 %v1739_v52, %v843_v47  ;;  %1844 = vmatmul.mubr.msk.f32.vlgmr.msra.gmra.mxu1 %vm1025_vm0, %v995_v54  ;;  %v859_v51 = vadd.f32 %v1687_v61, %v762_v50  ;;  %v1629_v54 = vadd.f32 %v2406_v4, %v2404_v3  ;;  %v1632_v4 = vadd.f32 %v2412_v7, %v2410_v6  ;;  %v1706_v6 = vpop.f32.mrf.mxu1 }
 0x130   :  { %v1741_v26 = vpop.f32.mrf.mxu0  ;;  %1868 = vmatpush3.msra.mxu1 %v2377_v46 }
 0x131   :  { %v996_v35 = vmax.f32 %v940_v34, 0.0  ;;  %v1742_v36 = vadd.f32 %v1741_v26, %v1740_v32  ;;  %1869 = vmatprep.subr.mxu1 %v1241_v33  ;;  %v765_v32 = vadd.f32 %v1626_v5, %v2447_v24  ;;  %v770_v55 = vadd.f32 %v1629_v54, %v2447_v24  ;;  %v1707_v39 = vpop.f32.mrf.mxu1 }
 0x132   :  { %v1743_v38 = vpop.f32.mrf.mxu0  ;;  %1870 = vmatpush3.msra.mxu1 %v1241_v33 }
 0x133   :  { %v943_v46 = vadd.f32 %v1742_v36, %v846_v60  ;;  %1846 = vmatprep.mubr.msk.f32.mxu1 %vm1025_vm0, %v996_v35  ;;  %1871 = vmatprep.subr.mxu1 %v1240_v57  ;;  %v862_v3 = vadd.f32 %v1690_v11, %v765_v32  ;;  %v867_v35 = vadd.f32 %v1693_v56, %v770_v55 }
 0x134   :  { %v1744_v58 = vpop.f32.mrf.mxu0  ;;  %1872 = vmatpush3.msra.mxu1 %v1240_v57  ;;  %v1635_v36 = vadd.f32 %v2418_v10, %v2416_v9  ;;  %v1638_v10 = vadd.f32 %v2424_v13, %v2422_v12 }
 0x135   :  { %v997_v23 = vmax.f32 %v943_v46, 0.0  ;;  %v1745_v42 = vadd.f32 %v1744_v58, %v1743_v38  ;;  %1873 = vmatprep.subr.mxu1 %v1239_v63  ;;  %v1699_v58 = vadd.f32 %v2485_v37, %v2470_v53  ;;  %v1702_v53 = vadd.f32 %v1701_v49, %v2496_v43 }
 0x136   :  { %v1746_v44 = vpop.f32.mrf.mxu0  ;;  %1874 = vmatpush3.msra.mxu1 %v1239_v63  ;;  %v773_v63 = vadd.f32 %v1632_v4, %v2447_v24  ;;  %v778_v40 = vadd.f32 %v1635_v36, %v2447_v24  ;;  %v781_v61 = vadd.f32 %v1638_v10, %v2447_v24  ;;  %v2655_v4 = vld [vmem:[#allocation3_spill] sm:$0xff] }
 0x137   :  { %v948_v45 = vadd.f32 %v1745_v42, %v851_v2  ;;  %1847 = vmatmul.mubr.msk.f32.gmra.mxu1 %vm1025_vm0, %v997_v23  ;;  %v1236_v10 = vld [vmem:[%s2648_s5 + $0x8] sm:$0xff] }
 0x138   :  { %v1747_v62 = vpop.f32.mrf.mxu0  ;;  %v870_v9 = vadd.f32 %v1696_v25, %v773_v63 }
 0x139   :  { %v998_v8 = vmax.f32 %v948_v45, 0.0  ;;  %v1748_v47 = vadd.f32 %v1747_v62, %v1746_v44  ;;  %v875_v44 = vadd.f32 %v1699_v58, %v778_v40  ;;  %v1641_v45 = vadd.f32 %v2430_v16, %v2428_v15 }
 0x13a   :  { %v1749_v29 = vpop.f32.mrf.mxu0  ;;  %v1644_v15 = vadd.f32 %v2436_v19, %v2434_v18 }
 0x13b   :  { %v951_v30 = vadd.f32 %v1748_v47, %v854_v28  ;;  %1849 = vmatprep.mubr.msk.f32.mxu1 %vm1025_vm0, %v998_v8  ;;  %v1709_v28 = vpop.f32.mrf.mxu1  ;;  %v786_v5 = vadd.f32 %v1641_v45, %v2447_v24  ;;  %v1705_v8 = vadd.f32 %v1704_v17, %v1703_v0 }
 0x13c   :  { %v1750_v52 = vpop.f32.mrf.mxu0  ;;  %v789_v11 = vadd.f32 %v1644_v15, %v2447_v24 }
 0x13d   :  { %v999_v14 = vmax.f32 %v951_v30, 0.0  ;;  %v1751_v33 = vadd.f32 %v1750_v52, %v1749_v29  ;;  %v878_v29 = vadd.f32 %v1702_v53, %v781_v61  ;;  %v883_v49 = vadd.f32 %v1705_v8, %v786_v5 }
 0x13e   :  { %v1752_v1 = vpop.f32.mrf.mxu0  ;;  %v1647_v52 = vadd.f32 %v2442_v22, %v2440_v21 }
 0x13f   :  { %v956_v34 = vadd.f32 %v1751_v33, %v859_v51  ;;  %1850 = vmatmul.mubr.msk.f32.gmra.mxu1 %vm1025_vm0, %v999_v14  ;;  %v1710_v51 = vpop.f32.mrf.mxu1  ;;  %v1708_v14 = vadd.f32 %v1707_v39, %v1706_v6 }
 0x140   :  { %v1753_v26 = vpop.f32.mrf.mxu0  ;;  %v794_v19 = vadd.f32 %v1647_v52, %v2447_v24  ;;  %v1711_v55 = vadd.f32 %v1710_v51, %v1709_v28 }
 0x141   :  { %v1000_v57 = vmax.f32 %v956_v34, 0.0  ;;  %v1754_v60 = vadd.f32 %v1753_v26, %v1752_v1  ;;  %v1712_v1 = vpop.f32.mrf.mxu1  ;;  %v886_v26 = vadd.f32 %v1708_v14, %v789_v11 }
 0x142   :  { %v1755_v20 = vpop.f32.mrf.mxu0 }
 0x143   :  { %v959_v27 = vadd.f32 %v1754_v60, %v862_v3  ;;  %1852 = vmatprep.mubr.msk.f32.mxu1 %vm1025_vm0, %v1000_v57  ;;  %v2654_v3 = vld [vmem:[#allocation2_spill] sm:$0xff]  ;;  %v1713_v60 = vpop.f32.mrf.mxu1 }
 0x144   :  { %v1756_v38 = vpop.f32.mrf.mxu0  ;;  %v1650_v57 = vadd.f32 %v2655_v4, %v2654_v3 }
 0x145   :  { %v1001_v31 = vmax.f32 %v959_v27, 0.0  ;;  %v1757_v46 = vadd.f32 %v1756_v38, %v1755_v20  ;;  %v891_v27 = vadd.f32 %v1711_v55, %v794_v19  ;;  %v1714_v38 = vadd.f32 %v1713_v60, %v1712_v1 }
 0x146   :  { %v1758_v7 = vpop.f32.mrf.mxu0  ;;  %v797_v36 = vadd.f32 %v1650_v57, %v2447_v24  ;;  %v1238_v24 = vld [vmem:[%s2648_s5 + $0x18] sm:$0xff] }
 0x147   :  { %v964_v2 = vadd.f32 %v1757_v46, %v867_v35  ;;  %1853 = vmatmul.mubr.msk.f32.gmra.mxu1 %vm1025_vm0, %v1001_v31  ;;  %1875 = vmatprep.subr.mxu1 %v1238_v24 }
 0x148   :  { %v1759_v59 = vpop.f32.mrf.mxu0  ;;  %1876 = vmatpush3.msra.mxu1 %v1238_v24 }
 0x149   :  { %v1002_v41 = vmax.f32 %v964_v2, 0.0  ;;  %v1760_v23 = vadd.f32 %v1759_v59, %v1758_v7  ;;  %v894_v7 = vadd.f32 %v1714_v38, %v797_v36 }
 0x14a   :  { %v1761_v48 = vpop.f32.mrf.mxu0 }
 0x14b   :  { %v967_v42 = vadd.f32 %v1760_v23, %v870_v9  ;;  %1855 = vmatprep.mubr.msk.f32.mxu1 %vm1025_vm0, %v1002_v41  ;;  %v1237_v9 = vld [vmem:[%s2648_s5 + $0x10] sm:$0xff]  ;;  %v1235_v41 = vld [vmem:[%s2648_s5] sm:$0xff] }
 0x14c   :  { %v1762_v50 = vpop.f32.mrf.mxu0  ;;  %1877 = vmatprep.subr.mxu1 %v1237_v9  ;;  %v1554_v23 = vld [vmem:[%s2650_s4] ss:$0 sm:$0xff] }
 0x14d   :  { %v1003_v37 = vmax.f32 %v967_v42, 0.0  ;;  %v1763_v62 = vadd.f32 %v1762_v50, %v1761_v48  ;;  %1878 = vmatpush3.msra.mxu1 %v1237_v9 }
 0x14e   :  { %v1764_v12 = vpop.f32.mrf.mxu0  ;;  %1879 = vmatprep.subr.mxu1 %v1236_v10 }
 0x14f   :  { %v972_v13 = vadd.f32 %v1763_v62, %v875_v44  ;;  %1856 = vmatmul.mubr.msk.f32.gmra.mxu1 %vm1025_vm0, %v1003_v37 }
 0x150   :  { %v1765_v47 = vpop.f32.mrf.mxu0  ;;  %1880 = vmatpush3.msra.mxu1 %v1236_v10 }
 0x151   :  { %v1004_v16 = vmax.f32 %v972_v13, 0.0  ;;  %v1766_v30 = vadd.f32 %v1765_v47, %v1764_v12  ;;  %1881 = vmatprep.subr.mxu1 %v1235_v41 }
 0x152   :  { %v1767_v54 = vpop.f32.mrf.mxu0  ;;  %1882 = vmatpush3.msra.mxu1 %v1235_v41 }
 0x153   :  { %v975_v43 = vadd.f32 %v1766_v30, %v878_v29  ;;  %1858 = vmatprep.mubr.msk.f32.mxu1 %vm1025_vm0, %v1004_v16 }
 0x154   :  { %v1768_v32 = vpop.f32.mrf.mxu0 }
 0x155   :  { %v1005_v33 = vmax.f32 %v975_v43, 0.0  ;;  %v1769_v0 = vadd.f32 %v1768_v32, %v1767_v54 }
 0x156   :  { %v1770_v34 = vpop.f32.mrf.mxu0 }
 0x157   :  { %v980_v18 = vadd.f32 %v1769_v0, %v883_v49  ;;  %1859 = vmatmul.mubr.msk.f32.gmra.mxu1 %vm1025_vm0, %v1005_v33 }
 0x158   :  { %v1771_v56 = vpop.f32.mrf.mxu0 }
 0x159   :  { %v1006_v21 = vmax.f32 %v980_v18, 0.0  ;;  %v1772_v22 = vadd.f32 %v1771_v56, %v1770_v34 }
 0x15a   :  { %v1773_v17 = vpop.f32.mrf.mxu0 }
 0x15b   :  { %v983_v20 = vadd.f32 %v1772_v22, %v886_v26  ;;  %1861 = vmatprep.mubr.msk.f32.mxu1 %vm1025_vm0, %v1006_v21 }
 0x15c   :  { %v1774_v35 = vpop.f32.mrf.mxu0 }
 0x15d   :  { %v1007_v63 = vmax.f32 %v983_v20, 0.0  ;;  %v1775_v25 = vadd.f32 %v1774_v35, %v1773_v17 }
 0x15e   :  { %v1776_v31 = vpop.f32.mrf.mxu0 }
 0x15f   :  { %v988_v46 = vadd.f32 %v1775_v25, %v891_v27  ;;  %1862 = vmatmul.mubr.msk.f32.gmra.mxu1 %vm1025_vm0, %v1007_v63 }
 0x160   :  { %v1777_v6 = vpop.f32.mrf.mxu0 }
 0x161   :  { %v1008_v2 = vmax.f32 %v988_v46, 0.0  ;;  %v1778_v40 = vadd.f32 %v1777_v6, %v1776_v31 }
 0x163   :  { %v991_v58 = vadd.f32 %v1778_v40, %v894_v7  ;;  %1864 = vmatprep.mubr.msk.f32.mxu1 %vm1025_vm0, %v1008_v2 }
 0x165   :  { %v1009_v59 = vmax.f32 %v991_v58, 0.0 }
 0x167   :  { %1865 = vmatmul.mubr.msk.f32.gmra.mxu1 %vm1025_vm0, %v1009_v59 }
 0x1ef   :  { %v1845_v39 = vpop.f32.mrf.mxu1 }
 0x1f0   :  { %v1146_v48 = vadd.f32 %v1845_v39, %v1554_v23 }
 0x1f1   :  { %v1140_v42 = vpop.f32.mrf.mxu1 }
 0x1f2   :  { %v1141_v44 = vadd.f32 %v1554_v23, %v1140_v42  ;;  %v1220_v50 = vmax.f32 %v1146_v48, 0.0 }
 0x1f4   :  { %v1219_v45 = vmax.f32 %v1141_v44, 0.0 }
 0x1f6   :  { %1883 = vmatprep.mubr.msk.f32.mxu1 %vm1025_vm0, %v1219_v45 }
 0x1f7   :  { %v1848_v61 = vpop.f32.mrf.mxu1  ;;  %1884 = vmatmul.mubr.msk.f32.vlgmr.msra.gmra.mxu1 %vm1025_vm0, %v1220_v50 }
 0x1f8   :  { %v1156_v53 = vadd.f32 %v1848_v61, %v1554_v23 }
 0x1f9   :  { %v1150_v37 = vpop.f32.mrf.mxu1 }
 0x1fa   :  { %v1151_v62 = vadd.f32 %v1554_v23, %v1150_v37  ;;  %v1222_v12 = vmax.f32 %v1156_v53, 0.0 }
 0x1fc   :  { %v1221_v28 = vmax.f32 %v1151_v62, 0.0 }
 0x1fe   :  { %1886 = vmatprep.mubr.msk.f32.mxu1 %vm1025_vm0, %v1221_v28 }
 0x1ff   :  { %v1851_v13 = vpop.f32.mrf.mxu1  ;;  %1887 = vmatmul.mubr.msk.f32.gmra.mxu1 %vm1025_vm0, %v1222_v12 }
 0x200   :  { %v1166_v5 = vadd.f32 %v1851_v13, %v1554_v23 }
 0x201   :  { %v1160_v8 = vpop.f32.mrf.mxu1 }
 0x202   :  { %v1161_v47 = vadd.f32 %v1554_v23, %v1160_v8  ;;  %v1224_v15 = vmax.f32 %v1166_v5, 0.0 }
 0x204   :  { %v1223_v29 = vmax.f32 %v1161_v47, 0.0 }
 0x206   :  { %1889 = vmatprep.mubr.msk.f32.mxu1 %vm1025_vm0, %v1223_v29 }
 0x207   :  { %v1854_v16 = vpop.f32.mrf.mxu1  ;;  %1890 = vmatmul.mubr.msk.f32.gmra.mxu1 %vm1025_vm0, %v1224_v15 }
 0x208   :  { %v1176_v30 = vadd.f32 %v1854_v16, %v1554_v23 }
 0x209   :  { %v1170_v51 = vpop.f32.mrf.mxu1 }
 0x20a   :  { %v1171_v54 = vadd.f32 %v1554_v23, %v1170_v51  ;;  %v1226_v49 = vmax.f32 %v1176_v30, 0.0 }
 0x20c   :  { %v1225_v43 = vmax.f32 %v1171_v54, 0.0 }
 0x20e   :  { %1892 = vmatprep.mubr.msk.f32.mxu1 %vm1025_vm0, %v1225_v43 }
 0x20f   :  { %v1857_v52 = vpop.f32.mrf.mxu1  ;;  %1893 = vmatmul.mubr.msk.f32.gmra.mxu1 %vm1025_vm0, %v1226_v49 }
 0x210   :  { %v1186_v32 = vadd.f32 %v1857_v52, %v1554_v23 }
 0x211   :  { %v1180_v11 = vpop.f32.mrf.mxu1 }
 0x212   :  { %v1181_v14 = vadd.f32 %v1554_v23, %v1180_v11  ;;  %v1228_v0 = vmax.f32 %v1186_v32, 0.0 }
 0x214   :  { %v1227_v33 = vmax.f32 %v1181_v14, 0.0 }
 0x216   :  { %1895 = vmatprep.mubr.msk.f32.mxu1 %vm1025_vm0, %v1227_v33 }
 0x217   :  { %v1860_v1 = vpop.f32.mrf.mxu1  ;;  %1896 = vmatmul.mubr.msk.f32.gmra.mxu1 %vm1025_vm0, %v1228_v0 }
 0x218   :  { %v1196_v34 = vadd.f32 %v1860_v1, %v1554_v23 }
 0x219   :  { %v1190_v18 = vpop.f32.mrf.mxu1 }
 0x21a   :  { %v1191_v19 = vadd.f32 %v1554_v23, %v1190_v18  ;;  %v1230_v56 = vmax.f32 %v1196_v34, 0.0 }
 0x21c   :  { %v1229_v55 = vmax.f32 %v1191_v19, 0.0 }
 0x21e   :  { %1898 = vmatprep.mubr.msk.f32.mxu1 %vm1025_vm0, %v1229_v55 }
 0x21f   :  { %v1863_v26 = vpop.f32.mrf.mxu1  ;;  %1899 = vmatmul.mubr.msk.f32.gmra.mxu1 %vm1025_vm0, %v1230_v56 }
 0x220   :  { %v1206_v3 = vadd.f32 %v1863_v26, %v1554_v23 }
 0x221   :  { %v1200_v4 = vpop.f32.mrf.mxu1 }
 0x222   :  { %v1201_v57 = vadd.f32 %v1554_v23, %v1200_v4  ;;  %v1232_v22 = vmax.f32 %v1206_v3, 0.0 }
 0x224   :  { %v1231_v21 = vmax.f32 %v1201_v57, 0.0 }
 0x226   :  { %1901 = vmatprep.mubr.msk.f32.mxu1 %vm1025_vm0, %v1231_v21 }
 0x227   :  { %v1866_v60 = vpop.f32.mrf.mxu1  ;;  %1902 = vmatmul.mubr.msk.f32.gmra.mxu1 %vm1025_vm0, %v1232_v22 }
 0x228   :  { %v1216_v17 = vadd.f32 %v1866_v60, %v1554_v23 }
 0x229   :  { %v1210_v20 = vpop.f32.mrf.mxu1 }
 0x22a   :  { %v1211_v27 = vadd.f32 %v1554_v23, %v1210_v20  ;;  %v1234_v36 = vmax.f32 %v1216_v17, 0.0 }
 0x22c   :  { %v1233_v35 = vmax.f32 %v1211_v27, 0.0 }
 0x22e   :  { %1904 = vmatprep.mubr.msk.f32.mxu1 %vm1025_vm0, %v1233_v35 }
 0x22f   :  { %1905 = vmatmul.mubr.msk.f32.gmra.mxu1 %vm1025_vm0, %v1234_v36 }
 0x2b7   :  { %v1885_v38 = vpop.f32.mrf.mxu1 }
 0x2b8   :  { %1438 = vst.msk [vmem:[%s2651_s6 + $0x8] sm:$0xff] %vm1436_vm1, %v1885_v38 }
 0x2b9   :  { %v1357_v63 = vpop.f32.mrf.mxu1 }
 0x2ba   :  { %1437 = vst.msk [vmem:[%s2651_s6] sm:$0xff] %vm1436_vm1, %v1357_v63 }
 0x2bf   :  { %v1888_v25 = vpop.f32.mrf.mxu1 }
 0x2c0   :  { %1440 = vst.msk [vmem:[%s2651_s6 + $0x18] sm:$0xff] %vm1436_vm1, %v1888_v25 }
 0x2c1   :  { %v1367_v31 = vpop.f32.mrf.mxu1 }
 0x2c2   :  { %1439 = vst.msk [vmem:[%s2651_s6 + $0x10] sm:$0xff] %vm1436_vm1, %v1367_v31 }
 0x2c7   :  { %v1891_v46 = vpop.f32.mrf.mxu1 }
 0x2c8   :  { %1442 = vst.msk [vmem:[%s2651_s6 + $0x28] sm:$0xff] %vm1436_vm1, %v1891_v46 }
 0x2c9   :  { %v1377_v6 = vpop.f32.mrf.mxu1 }
 0x2ca   :  { %1441 = vst.msk [vmem:[%s2651_s6 + $0x20] sm:$0xff] %vm1436_vm1, %v1377_v6 }
 0x2cf   :  { %v1894_v7 = vpop.f32.mrf.mxu1 }
 0x2d0   :  { %1444 = vst.msk [vmem:[%s2651_s6 + $0x38] sm:$0xff] %vm1436_vm1, %v1894_v7 }
 0x2d1   :  { %v1387_v2 = vpop.f32.mrf.mxu1 }
 0x2d2   :  { %1443 = vst.msk [vmem:[%s2651_s6 + $0x30] sm:$0xff] %vm1436_vm1, %v1387_v2 }
 0x2d7   :  { %v1897_v40 = vpop.f32.mrf.mxu1 }
 0x2d8   :  { %1446 = vst.msk [vmem:[%s2651_s6 + $0x48] sm:$0xff] %vm1436_vm1, %v1897_v40 }
 0x2d9   :  { %v1397_v58 = vpop.f32.mrf.mxu1 }
 0x2da   :  { %1445 = vst.msk [vmem:[%s2651_s6 + $0x40] sm:$0xff] %vm1436_vm1, %v1397_v58 }
 0x2df   :  { %v1900_v59 = vpop.f32.mrf.mxu1 }
 0x2e0   :  { %1448 = vst.msk [vmem:[%s2651_s6 + $0x58] sm:$0xff] %vm1436_vm1, %v1900_v59 }
 0x2e1   :  { %v1407_v24 = vpop.f32.mrf.mxu1 }
 0x2e2   :  { %1447 = vst.msk [vmem:[%s2651_s6 + $0x50] sm:$0xff] %vm1436_vm1, %v1407_v24 }
 0x2e7   :  { %v1903_v9 = vpop.f32.mrf.mxu1 }
 0x2e8   :  { %1450 = vst.msk [vmem:[%s2651_s6 + $0x68] sm:$0xff] %vm1436_vm1, %v1903_v9 }
 0x2e9   :  { %v1417_v10 = vpop.f32.mrf.mxu1 }
 0x2ea   :  { %1449 = vst.msk [vmem:[%s2651_s6 + $0x60] sm:$0xff] %vm1436_vm1, %v1417_v10 }
 0x2ef   :  { %v1906_v41 = vpop.f32.mrf.mxu1 }
 0x2f0   :  { %1452 = vst.msk [vmem:[%s2651_s6 + $0x78] sm:$0xff] %vm1436_vm1, %v1906_v41 }
 0x2f1   :  { %v1427_v23 = vpop.f32.mrf.mxu1 }
 0x2f2   :  { %1451 = vst.msk [vmem:[%s2651_s6 + $0x70] sm:$0xff] %vm1436_vm1, %v1427_v23 }

</bundles_post_ra>
